<compile_context>
chip_gen: v5e
topology: v5e:2x2
jax: 0.10.0
libtpu: 0.0.40
codegen_flags: <defaults>
</compile_context>

<pallas_src>
import functools

import jax
import jax.numpy as jnp
import numpy as np
from jax.experimental import pallas as pl
from jax.experimental.pallas import tpu as pltpu


_LANE = 128
_SUBLANE = 16          # row-padding granularity (covers bf16's (16,128) tiles)


def _round_up(x, m):
    return ((x + m - 1) // m) * m


def _vmem_capacity_bytes():
    # Generation-aware: v7x has 64 MiB per TC, v5e/v6e have 128 MiB.
    try:
        return int(pltpu.get_tpu_info().vmem_capacity_bytes)
    except Exception:
        return 64 * 1024 * 1024          # conservative fallback


def _choose_tm(n, d_pad, c, in_bytes, vmem_budget):
    """Largest row tile (multiple of 128, <=2048) fitting the VMEM budget with
    double buffering; small batches get a single full-extent tile."""
    n_min = _round_up(n, _SUBLANE)
    c_pad = _round_up(c, 8)
    # Resident operands, counting the double-buffered copies the pipeline keeps
    # even for constant-index inputs (review: W must be counted twice).
    resident = (2 * c_pad * d_pad * in_bytes          # weight, 2 buffers
                + 2 * c_pad * _LANE * 4               # bias (lane-padded), 2 buffers
                + 2 * 2 * c_pad * _LANE * 4)          # (2C, C) output slab, 2 buffers
    # Streamed per feature row: double-buffered f row + two f32 mask entries.
    per_row = 2 * d_pad * in_bytes + 2 * 2 * 4
    tm = (vmem_budget - resident) // max(per_row, 1)
    tm = max(_LANE, (tm // _LANE) * _LANE)
    tm = min(tm, 2048)
    if n_min <= tm:
        return n_min          # single tile: blocks equal the full array dims
    return int(tm)


# -----------------------------------------------------------------------------
# Pallas kernel: fused linear + softmax + fused masked Gram accumulation.
# -----------------------------------------------------------------------------
def _gram_kernel(f_ref, w_ref, b_ref, mask_ref, g_ref, *, fast):
    # f_ref:    (tm, D_pad)   feature row tile (bf16 or f32), streamed
    # w_ref:    (C, D_pad)    classifier weight, resident
    # b_ref:    (C, 1)        classifier bias (f32), resident
    # mask_ref: (2, tm)       [source; target] row multiplicity masks (f32)
    # g_ref:    (2C, C)       per-core accumulator [G_s ; G_t] (VMEM-resident)
    @pl.when(pl.program_id(1) == 0)
    def _init():
        g_ref[...] = jnp.zeros_like(g_ref)

    # logits^T (C, tm) = W (C, D_pad) . f_tile^T  -> lane-dense in tm (MXU).
    logits_t = jax.lax.dot_general(
        w_ref[...], f_ref[...], (((1,), (1,)), ((), ())),
        preferred_element_type=jnp.float32)
    logits_t = logits_t + b_ref[...]                    # (C, 1) broadcast, f32

    # Row-wise softmax == per-column softmax in this transposed layout.
    m = jnp.max(logits_t, axis=0, keepdims=True)        # (1, tm)
    e = jnp.exp(logits_t - m)                           # EUP
    s = jnp.sum(e, axis=0, keepdims=True)               # (1, tm)
    if fast:
        p_t = e * pl.reciprocal(s, approx=True)         # EUP reciprocal
    else:
        p_t = e / s                                     # (C, tm) f32

    # Fused Gram update: one MXU pass producing [G_s ; G_t] (2C, C).
    lhs = jnp.concatenate(
        [p_t * mask_ref[0:1, :], p_t * mask_ref[1:2, :]], axis=0)   # (2C, tm)
    rhs = p_t
    if fast:
        lhs = lhs.astype(jnp.bfloat16)                  # single-pass MXU inputs
        rhs = rhs.astype(jnp.bfloat16)
    g_ref[...] += jax.lax.dot_general(
        lhs, rhs, (((1,), (1,)), ((), ())),
        preferred_element_type=jnp.float32)             # f32 accumulation


def _classifier_softmax_grams(f, source_idx, target_idx, weight, bias, *,
                              fast=True):
    """Returns (G_s, G_t) with G = P_idx^T @ P_idx, P = softmax(f @ W.T + b)."""
    N, D = f.shape
    C = weight.shape[0]
    in_dtype = jnp.bfloat16 if fast else jnp.float32
    in_bytes = 2 if fast else 4

    d_pad = _round_up(max(D, 1), _LANE)                 # lane-dense K dim

    cap = _vmem_capacity_bytes()
    vmem_budget = int(0.45 * cap)
    vmem_limit = min(int(0.70 * cap), 100 * 1024 * 1024)

    tm = _choose_tm(N, d_pad, C, in_bytes, vmem_budget)

    n_tiles = -(-N // tm)
    num_cores = 2 if n_tiles >= 2 else 1                # v7x: 2 TCs; harmless on 1-TC chips
    spc = -(-n_tiles // num_cores)                      # steps per core
    n_pad = num_cores * spc * tm

    f_in = jnp.pad(f.astype(in_dtype), ((0, n_pad - N), (0, d_pad - D)))
    w_in = jnp.pad(weight.astype(in_dtype), ((0, 0), (0, d_pad - D)))
    b2 = bias.reshape(C, 1).astype(jnp.float32)

    # Row-membership multiplicity masks (repeated indices handled exactly);
    # padded rows stay 0 so they contribute nothing to the Grams.
    masks = jnp.zeros((2, n_pad), jnp.float32)
    masks = masks.at[0, source_idx].add(1.0)
    masks = masks.at[1, target_idx].add(1.0)

    kernel = functools.partial(_gram_kernel, fast=fast)
    out = pl.pallas_call(
        kernel,
        out_shape=jax.ShapeDtypeStruct((num_cores, 2 * C, C), jnp.float32),
        grid_spec=pltpu.PrefetchScalarGridSpec(
            num_scalar_prefetch=0,
            grid=(num_cores, spc),
            in_specs=[
                pl.BlockSpec((tm, d_pad),
                             lambda c, i, spc=spc: (c * spc + i, 0)),   # f tile
                pl.BlockSpec((C, d_pad), lambda c, i: (0, 0)),          # weight
                pl.BlockSpec((C, 1), lambda c, i: (0, 0)),              # bias
                pl.BlockSpec((2, tm),
                             lambda c, i, spc=spc: (0, c * spc + i)),   # masks
            ],
            out_specs=pl.BlockSpec((None, 2 * C, C),
                                   lambda c, i: (c, 0, 0)),             # per-core slab
        ),
        compiler_params=pltpu.CompilerParams(
            # Core axis is independent (megacore-shardable); the step axis is a
            # reduction over the resident per-core slab.
            dimension_semantics=("parallel", "arbitrary"),
            vmem_limit_bytes=vmem_limit,
        ),
    )(f_in, w_in, b2, masks)

    g = jnp.sum(out, axis=0)                            # combine per-core slabs
    return g[:C], g[C:]


# -----------------------------------------------------------------------------
# Module-level forward glue (matches PyTorch semantics).
# -----------------------------------------------------------------------------
def warm_start_grl_forward(x, *, alpha=1.0, lo=0.0, hi=1.0, max_iter=10000,
                           iter_num=0):
    # Forward is identity (coeff only scales/negates the backward gradient).
    _coeff = float(2.0 * (hi - lo) / (1.0 + np.exp(-alpha * iter_num / max_iter))
                   - (hi - lo) + lo)
    del _coeff
    return x


def _nuclear_norm_from_gram(g):
    # ||P||_* = sum_i sigma_i(P) = sum_i sqrt(lambda_i(P^T P)).
    # TODO(synk): eigendecomposition/SVD has no Pallas TPU equivalent; it stays
    # in plain JAX (XLA) on the tiny CxC Gram matrix.
    g = 0.5 * (g + g.T)
    ev = jnp.linalg.eigvalsh(g)
    return jnp.sum(jnp.sqrt(jnp.maximum(ev, 0.0)))      # clamp: no NaN in f32


def nuclear_wasserstein_discrepancy(f, source_idx, target_idx, weight, bias, *,
                                    fast=True):
    feature_grl = warm_start_grl_forward(f)
    g_s, g_t = _classifier_softmax_grams(feature_grl, source_idx, target_idx,
                                         weight, bias, fast=fast)
    nuc_s = _nuclear_norm_from_gram(g_s)
    nuc_t = _nuclear_norm_from_gram(g_t)
    return (-nuc_t / target_idx.shape[0] + nuc_s / source_idx.shape[0])


# -----------------------------------------------------------------------------
if __name__ == "__main__":
    N, D, C = 16, 32, 8   # batch, feature dim, num classes

    key = jax.random.PRNGKey(0)
    kf, kw, kb = jax.random.split(key, 3)

    f = jax.random.normal(kf, (N, D), dtype=jnp.float32)

    # Deterministic classifier params (nn.Linear(D, C) style init).
    bound = 1.0 / np.sqrt(D)
    weight = jax.random.uniform(kw, (C, D), minval=-bound, maxval=bound,
                                dtype=jnp.float32)
    bias = jax.random.uniform(kb, (C,), minval=-bound, maxval=bound,
                              dtype=jnp.float32)

    source_idx = jnp.arange(0, N // 2, dtype=jnp.int32)
    target_idx = jnp.arange(N // 2, N, dtype=jnp.int32)

    # Fast path (bf16 streaming + bf16 Gram inputs + approx reciprocal).
    loss_fast = nuclear_wasserstein_discrepancy(f, source_idx, target_idx,
                                                weight, bias, fast=True)
    jax.block_until_ready(loss_fast)

    # Exact path (f32 streaming, exact divide) for a tighter sanity check.
    loss_exact = nuclear_wasserstein_discrepancy(f, source_idx, target_idx,
                                                 weight, bias, fast=False)
    jax.block_until_ready(loss_exact)

    # Pure-JAX reference matching the PyTorch forward semantics.
    probs_ref = jax.nn.softmax(f @ weight.T + bias, axis=1)
    nuc = lambda p: jnp.sum(jnp.linalg.svd(p, compute_uv=False))
    loss_ref = (-nuc(probs_ref[target_idx]) / target_idx.shape[0]
                + nuc(probs_ref[source_idx]) / source_idx.shape[0])

    # Structural check on the Gram accumulators (exact path).
    g_s, g_t = _classifier_softmax_grams(f, source_idx, target_idx, weight,
                                         bias, fast=False)
    g_s_ref = probs_ref[source_idx].T @ probs_ref[source_idx]
    g_t_ref = probs_ref[target_idx].T @ probs_ref[target_idx]
    assert np.allclose(np.asarray(g_s), np.asarray(g_s_ref), atol=1e-2), "G_s"
    assert np.allclose(np.asarray(g_t), np.asarray(g_t_ref), atol=1e-2), "G_t"

    assert np.allclose(np.asarray(loss_exact), np.asarray(loss_ref),
                       atol=2e-2), (loss_exact, loss_ref)
    assert np.allclose(np.asarray(loss_fast), np.asarray(loss_ref),
                       atol=5e-2), (loss_fast, loss_ref)

    print("KERNEL_OK")
</pallas_src>

<mosaic_0001>
module attributes {stable_mosaic.version = 11 : i64} {
  func.func @_gram_kernel(%arg0: i32, %arg1: i32, %arg2: memref<16x128xbf16, #tpu.memory_space<vmem>>, %arg3: memref<8x128xbf16, #tpu.memory_space<vmem>>, %arg4: memref<8x1xf32, #tpu.memory_space<vmem>>, %arg5: memref<2x16xf32, #tpu.memory_space<vmem>>, %arg6: memref<1x16x8xf32, #tpu.memory_space<vmem>>) attributes {dimension_semantics = [#tpu.dimension_semantics<parallel>, #tpu.dimension_semantics<arbitrary>], iteration_bounds = array<i64: 1, 1>, scalar_prefetch = 0 : i64, scratch_operands = 0 : i64, tpu.core_type = #tpu.core_type<tc>, window_params = [{transform_indices = @transform_0, window_bounds = array<i64: 16, 128>}, {pipeline_mode = #tpu.pipeline_mode<synchronous>, transform_indices = @transform_1, window_bounds = array<i64: 8, 128>}, {pipeline_mode = #tpu.pipeline_mode<synchronous>, transform_indices = @transform_2, window_bounds = array<i64: 8, 1>}, {transform_indices = @transform_3, window_bounds = array<i64: 2, 16>}, {transform_indices = @transform_4, window_bounds = array<i64: 1, 16, 8>}]} {
    %c0_i32 = arith.constant 0 : i32
    %0 = arith.cmpi eq, %arg1, %c0_i32 : i32
    %1 = arith.extui %0 : i1 to i32
    %c0_i32_0 = arith.constant 0 : i32
    %2 = arith.cmpi ne, %1, %c0_i32_0 : i32
    scf.if %2 {
      %cst_18 = arith.constant 0.000000e+00 : f32
      %35 = vector.broadcast %cst_18 : f32 to vector<16x8xf32>
      %c0_19 = arith.constant 0 : index
      %c0_20 = arith.constant 0 : index
      %c0_21 = arith.constant 0 : index
      %36 = vector.load %arg6[%c0_19, %c0_20, %c0_21] : memref<1x16x8xf32, #tpu.memory_space<vmem>>, vector<1x16x8xf32>
      %37 = vector.shape_cast %36 : vector<1x16x8xf32> to vector<16x8xf32>
      %38 = vector.shape_cast %35 : vector<16x8xf32> to vector<1x16x8xf32>
      tpu.vector_store %arg6[%c0_19, %c0_20, %c0_21], %38 {strides = array<i32>} : memref<1x16x8xf32, #tpu.memory_space<vmem>>, vector<1x16x8xf32>,
    } else {
    }
    %c0 = arith.constant 0 : index
    %c0_1 = arith.constant 0 : index
    %3 = vector.load %arg3[%c0, %c0_1] : memref<8x128xbf16, #tpu.memory_space<vmem>>, vector<8x128xbf16>
    %c0_2 = arith.constant 0 : index
    %c0_3 = arith.constant 0 : index
    %4 = vector.load %arg2[%c0_2, %c0_3] : memref<16x128xbf16, #tpu.memory_space<vmem>>, vector<16x128xbf16>
    %cst = arith.constant dense<0.000000e+00> : vector<8x16xf32>
    %5 = tpu.matmul %3, %4, %cst {dimension_numbers = #tpu.dot_dimension_numbers<[1], [1], [0], [0], [0, 0, 1, 0], [], []>} : vector<8x128xbf16>, vector<16x128xbf16>, vector<8x16xf32> -> vector<8x16xf32>
    %c0_4 = arith.constant 0 : index
    %c0_5 = arith.constant 0 : index
    %6 = vector.load %arg4[%c0_4, %c0_5] : memref<8x1xf32, #tpu.memory_space<vmem>>, vector<8x1xf32>
    %7 = vector.broadcast %6 : vector<8x1xf32> to vector<8x16xf32>
    %8 = arith.addf %5, %7 : vector<8x16xf32>
    %cst_6 = arith.constant dense<0xFF800000> : vector<16xf32>
    %9 = vector.multi_reduction <maximumf>, %8, %cst_6 [0] : vector<8x16xf32> to vector<16xf32>
    %10 = vector.shape_cast %9 : vector<16xf32> to vector<1x16xf32>
    %11 = vector.broadcast %10 : vector<1x16xf32> to vector<8x16xf32>
    %12 = arith.subf %8, %11 : vector<8x16xf32>
    %13 = math.exp %12 : vector<8x16xf32>
    %cst_7 = arith.constant dense<0.000000e+00> : vector<16xf32>
    %14 = vector.multi_reduction <add>, %13, %cst_7 [0] : vector<8x16xf32> to vector<16xf32>
    %15 = vector.shape_cast %14 : vector<16xf32> to vector<1x16xf32>
    %16 = tpu.reciprocal %15 {approx = true} : vector<1x16xf32> -> vector<1x16xf32>
    %17 = vector.broadcast %16 : vector<1x16xf32> to vector<8x16xf32>
    %18 = arith.mulf %13, %17 : vector<8x16xf32>
    %c0_8 = arith.constant 0 : index
    %c0_9 = arith.constant 0 : index
    %19 = vector.load %arg5[%c0_8, %c0_9] : memref<2x16xf32, #tpu.memory_space<vmem>>, vector<1x16xf32>
    %20 = vector.broadcast %19 : vector<1x16xf32> to vector<8x16xf32>
    %21 = arith.mulf %18, %20 : vector<8x16xf32>
    %c1 = arith.constant 1 : index
    %c0_10 = arith.constant 0 : index
    %22 = vector.load %arg5[%c1, %c0_10] : memref<2x16xf32, #tpu.memory_space<vmem>>, vector<1x16xf32>
    %23 = vector.broadcast %22 : vector<1x16xf32> to vector<8x16xf32>
    %24 = arith.mulf %18, %23 : vector<8x16xf32>
    %25 = tpu.concatenate %21, %24 in 0 : vector<8x16xf32>, vector<8x16xf32> -> vector<16x16xf32>
    %26 = arith.truncf %25 : vector<16x16xf32> to vector<16x16xbf16>
    %27 = arith.truncf %18 : vector<8x16xf32> to vector<8x16xbf16>
    %c0_11 = arith.constant 0 : index
    %c0_12 = arith.constant 0 : index
    %c0_13 = arith.constant 0 : index
    %28 = vector.load %arg6[%c0_11, %c0_12, %c0_13] : memref<1x16x8xf32, #tpu.memory_space<vmem>>, vector<1x16x8xf32>
    %29 = vector.shape_cast %28 : vector<1x16x8xf32> to vector<16x8xf32>
    %cst_14 = arith.constant dense<0.000000e+00> : vector<16x8xf32>
    %30 = tpu.matmul %26, %27, %cst_14 {dimension_numbers = #tpu.dot_dimension_numbers<[1], [1], [0], [0], [0, 0, 1, 0], [], []>} : vector<16x16xbf16>, vector<8x16xbf16>, vector<16x8xf32> -> vector<16x8xf32>
    %31 = arith.addf %29, %30 : vector<16x8xf32>
    %c0_15 = arith.constant 0 : index
    %c0_16 = arith.constant 0 : index
    %c0_17 = arith.constant 0 : index
    %32 = vector.load %arg6[%c0_15, %c0_16, %c0_17] : memref<1x16x8xf32, #tpu.memory_space<vmem>>, vector<1x16x8xf32>
    %33 = vector.shape_cast %32 : vector<1x16x8xf32> to vector<16x8xf32>
    %34 = vector.shape_cast %31 : vector<16x8xf32> to vector<1x16x8xf32>
    tpu.vector_store %arg6[%c0_15, %c0_16, %c0_17], %34 {strides = array<i32>} : memref<1x16x8xf32, #tpu.memory_space<vmem>>, vector<1x16x8xf32>,
    return
  }
  func.func @transform_0(%arg0: i32, %arg1: i32) -> (i32, i32) {
    %c1_i32 = arith.constant 1 : i32
    %0 = arith.muli %arg0, %c1_i32 : i32
    %1 = arith.addi %0, %arg1 : i32
    %c0_i32 = arith.constant 0 : i32
    %c0_i32_0 = arith.constant 0 : i32
    return %1, %c0_i32 : i32, i32
  }
  func.func @transform_1(%arg0: i32, %arg1: i32) -> (i32, i32) {
    %c0_i32 = arith.constant 0 : i32
    %c0_i32_0 = arith.constant 0 : i32
    %c0_i32_1 = arith.constant 0 : i32
    return %c0_i32, %c0_i32_0 : i32, i32
  }
  func.func @transform_2(%arg0: i32, %arg1: i32) -> (i32, i32) {
    %c0_i32 = arith.constant 0 : i32
    %c0_i32_0 = arith.constant 0 : i32
    %c0_i32_1 = arith.constant 0 : i32
    return %c0_i32, %c0_i32_0 : i32, i32
  }
  func.func @transform_3(%arg0: i32, %arg1: i32) -> (i32, i32) {
    %c1_i32 = arith.constant 1 : i32
    %0 = arith.muli %arg0, %c1_i32 : i32
    %1 = arith.addi %0, %arg1 : i32
    %c0_i32 = arith.constant 0 : i32
    %c0_i32_0 = arith.constant 0 : i32
    return %c0_i32, %1 : i32, i32
  }
  func.func @transform_4(%arg0: i32, %arg1: i32) -> (i32, i32, i32) {
    %c0_i32 = arith.constant 0 : i32
    %c0_i32_0 = arith.constant 0 : i32
    %c0_i32_1 = arith.constant 0 : i32
    return %arg0, %c0_i32, %c0_i32_0 : i32, i32, i32
  }
}

</mosaic_0001>

<bundles_post_ra>
// kernel: tpu_custom_call.1
= control target key start
LH: loop header
LB: loop body
LE: loop exit
PB: predicated region body
PF: predicated region fallthrough
CT: control target
= control target key end

     0   :  { %9 = vsyncpa [#allocation3], 0  ;;  %s310_s0 = inlined_call_operand.vmem [shape: bf16[16,128], index: 0, kind: input, shape index: {}]   ;;  %s311_s1 = inlined_call_operand.hbm [shape: bf16[8,128], index: 1, kind: input, shape index: {}]   ;;  %s312_s2 = inlined_call_operand.vmem [shape: f32[8,1], index: 2, kind: input, shape index: {}]   ;;  %s313_s3 = inlined_call_operand.hbm [shape: f32[2,16], index: 3, kind: input, shape index: {}]   ;;  %s314_s4 = inlined_call_operand.vmem [shape: f32[1,16,8], index: 4, kind: output, shape index: {}]  }
   0x1   :  { %s26_s17 = sshll.u32 %s311_s1, 4  ;;  %s27_s17 = int_to_ptr.hbm [resolvable:$true] %s26_s17 }
   0x2   :  { %10 = vsyncpa [#allocation5], 0  ;;  %s243_s18 = smov [#allocation2]   ;;  %s42_s22 = sshll.u32 %s313_s3, 4  ;;  %s43_s22 = int_to_ptr.hbm [resolvable:$true] %s42_s22 }
   0x3   :  { %s28_s19 = sshll.u32 %s243_s18, 4  ;;  %s244_s23 = smov [#allocation4]   ;;  %s29_s19 = int_to_ptr.vmem [resolvable:$true] %s28_s19 }
   0x4   :  { %31 = dma.hbm_to_vmem [thread:$0]  %s27_s17, 64, %s29_s19, [#allocation3]  }
   0x5   :  { %s44_s24 = sshll.u32 %s244_s23, 4  ;;  %s45_s24 = int_to_ptr.vmem [resolvable:$true] %s44_s24 }
   0x6   :  { %47 = dma.hbm_to_vmem [thread:$0]  %s43_s22, 32, %s45_s24, [#allocation5]  }
   0x7   :  { %239 = dma.done.wait [#allocation3], 64  }
   0x8   :  { %240 = vsyncadd [#allocation3], 4294967232 }
   0x9   :  { %241 = dma.done.wait [#allocation5], 32  }
   0xa   :  { %242 = vsyncadd [#allocation5], 4294967264  ;;  %v245_v0 = vmov 0   ;;  %v179_v1 = vld [vmem:[%s310_s0] sm:$0xff]  ;;  %vm107_vm0 = vcmask 130048   ;;  %vm76_vm1 = vcmask 64512  }
   0xb   :  { %184 = vset.pattern.permute.xlu0 %v245_v0  ;;  %v82_v2 = vld [vmem:[%s312_s2] sm:$0xff]  ;;  %101 = vmatpush.bf16.xpose.msra.mxu0 %v179_v1  ;;  %v246_v20 = vmov 0.0  }
   0xc   :  { %85 = vperm.xlu0 %184, %v82_v2   ;;  %v79_v3 = vld [vmem:[#allocation2] sm:$0xf]  ;;  %77 = vst.msk [vmem:[%s314_s4] sm:$0xff] %vm76_vm1, %v246_v20  ;;  %v185_v29 = vld [vmem:[#allocation4] ss:$0 sm:$0xff] }
   0xd   :  { %78 = vst.msk [vmem:[%s314_s4 + $0x8] sm:$0xff] %vm76_vm1, %v246_v20  ;;  %v186_v30 = vld [vmem:[#allocation4 + $0x1] ss:$0 sm:$0xff] }
  0x12   :  { %102 = vmatmul.bf16.vlgmr.msra.gmra.mxu0 %v79_v3 }
  0x13   :  { %v135_v35 = vld [vmem:[%s314_s4] sm:$0xff] }
  0x14   :  { %v136_v38 = vld [vmem:[%s314_s4 + $0x8] sm:$0xff] }
  0x7e   :  { %v86_v4 = vpop.permute.xlu0 %85 }
  0x8f   :  { %v103_v5 = vpop.f32.mrf.mxu0 }
  0x90   :  { %v104_v6 = vadd.f32 %v103_v5, %v86_v4 }
  0x92   :  { %v108_v7 = vsel %vm107_vm0, %v104_v6, -inf }
  0x93   :  { %v109_v8 = vrot.slane %v108_v7, 4 }
  0x95   :  { %v110_v9 = vmax.f32 %v108_v7, %v109_v8 }
  0x97   :  { %v111_v10 = vrot.slane %v110_v9, 2  ;;  %v105_v11 = vpop.f32.mrf.mxu0 }
  0x99   :  { %v112_v12 = vmax.f32 %v110_v9, %v111_v10 }
  0x9b   :  { %v113_v13 = vrot.slane %v112_v12, 1 }
  0x9d   :  { %v114_v14 = vmax.f32 %v112_v12, %v113_v13 }
  0x9f   :  { %v115_v15 = vsub.f32 %v104_v6, %v114_v14 }
  0xa1   :  { %v116_v16 = vmul.f32 1.442695, %v115_v15 }
  0xa3   :  { %187 = vpow2.f32 %v116_v16 }
  0xa9   :  { %v188_v17 = vpop.eup %187 }
  0xaa   :  { %v118_v18 = vsel %vm107_vm0, %v188_v17, 0.0 }
  0xab   :  { %v119_v19 = vrot.slane %v118_v18, 4 }
  0xad   :  { %v120_v21 = vadd.f32 %v119_v19, %v118_v18 }
  0xaf   :  { %v121_v22 = vrot.slane %v120_v21, 2 }
  0xb1   :  { %v122_v23 = vadd.f32 %v121_v22, %v120_v21 }
  0xb3   :  { %v123_v24 = vrot.slane %v122_v23, 1 }
  0xb5   :  { %v124_v25 = vadd.f32 %v123_v24, %v122_v23 }
  0xb7   :  { %189 = vrcp.f32 %v124_v25 }
  0xbd   :  { %v190_v26 = vpop.eup %189 }
  0xbe   :  { %v126_v27 = vmul.f32 %v190_v26, %v188_v17 }
  0xc0   :  { %v134_v28 = vpack.c.bf16 %v126_v27, %v126_v27  ;;  %v129_v32 = vmul.f32 %v185_v29, %v126_v27  ;;  %v132_v33 = vmul.f32 %v186_v30, %v126_v27 }
  0xc2   :  { %v141_v31 = vsel %vm107_vm0, %v134_v28, 0  ;;  %v133_v34 = vpack.c.bf16 %v132_v33, %v129_v32 }
  0xc3   :  { %150 = vmatpush.bf16.xpose.msra.mxu1 %v141_v31 }
  0xca   :  { %178 = vmatmul.msk.bf16.vlgmr.msra.gmra.mxu1 %vm107_vm0, %v133_v34 }
 0x147   :  { %v152_v36 = vpop.f32.mrf.mxu1 }
 0x148   :  { %v157_v37 = vadd.f32 %v152_v36, %v135_v35 }
 0x14a   :  { %160 = vst.msk [vmem:[%s314_s4] sm:$0xff] %vm76_vm1, %v157_v37 }
 0x14f   :  { %v154_v39 = vpop.f32.mrf.mxu1 }
 0x150   :  { %v158_v40 = vadd.f32 %v154_v39, %v136_v38 }
 0x152   :  { %161 = vst.msk [vmem:[%s314_s4 + $0x8] sm:$0xff] %vm76_vm1, %v158_v40 }
 0x153   :  { %166 = vsyncpa [#allocation3], 1 }
 0x154   :  { %167 = vsyncpa [#allocation5], 1 }

</bundles_post_ra>
